<compile_context>
chip_gen: v7x
topology: tpu7x:2x2x1
jax: 0.10.0
libtpu: 0.0.40
codegen_flags: <defaults>
</compile_context>

<pallas_src>
import jax
import jax.numpy as jnp
from jax.experimental import pallas as pl
from jax.experimental.pallas import tpu as pltpu


LANE = 128  # padded classifier width (lane-dense output)


# ----------------------------- Pallas kernel -----------------------------

def _elu(v):
    # F.elu with alpha=1.0; exp only ever sees non-positive inputs.
    return jnp.where(v > 0, v, jnp.exp(jnp.minimum(v, 0.0)) - 1.0)


def emb_gcn_kernel(x_ref,      # [N, E]    bf16  full embedded node features
                   a_ref,      # [TM, N]   bf16  row tile of normalized adjacency
                   wcat_ref,   # [E, 2H]   bf16  [W_conv1 | W_first_lin]
                   bf_ref,     # [1, H]    f32   first_lin bias
                   w2_ref,     # [H, H]    bf16  convs[0] weight
                   b12_ref,    # [1, 2H]   f32   [b_conv1 | b_conv2]
                   wl_ref,     # [H, 128]  bf16  lin2 weight, zero-padded
                   bl_ref,     # [1, 128]  f32   lin2 bias, -1e30 padded
                   out_ref):   # [TM, 128] f32   padded log-probs (row tile)
    x = x_ref[...]                       # bf16
    a = a_ref[...]                       # bf16
    h_dim = w2_ref.shape[0]

    # ---- fused x-side matmul: one pass of x through the MXU -------------
    xw = jnp.dot(x, wcat_ref[...], preferred_element_type=jnp.float32)   # [N, 2H]
    xw1 = xw[:, :h_dim]                                  # conv1 pre-propagation
    h = _elu(xw[:, h_dim:] + bf_ref[...])                # first_lin + ELU (dropout=id)
    hw2 = jnp.dot(h.astype(jnp.bfloat16), w2_ref[...],
                  preferred_element_type=jnp.float32)    # [N, H]

    # ---- fused adjacency propagation: one pass of A_hat through the MXU --
    cat = jnp.concatenate([xw1, hw2], axis=-1).astype(jnp.bfloat16)      # [N, 2H]
    prop = jnp.dot(a, cat, preferred_element_type=jnp.float32) + b12_ref[...]
    prop = _elu(prop)                                    # [TM, 2H]
    xs = prop[:, :h_dim] + prop[:, h_dim:]               # residual x1 + x

    # ---- classifier tail, padded to 128 lanes (lane-dense matmul/store) --
    logits = (jnp.dot(xs.astype(jnp.bfloat16), wl_ref[...],
                      preferred_element_type=jnp.float32) + bl_ref[...])  # [TM, 128]
    m = jnp.max(logits, axis=-1, keepdims=True)
    z = logits - m
    lse = jnp.log(jnp.sum(jnp.exp(z), axis=-1, keepdims=True))
    out_ref[...] = z - lse


def emb_gcn_forward(x_emb, a_hat, params, *, row_tile=None):
    """Fused EmbGCN forward (eval mode).

    x_emb  : [N, emb_dim] float32 (embedding-looked-up node features)
    a_hat  : [N, N]       float32 normalized adjacency (dense gcn_norm)
    params : dict of weights (stored [in, out]) and biases ([1, out])
    row_tile : optional node-row tile; None => single tile (best at small N,
               avoids recomputing the node-parallel x-side matmuls per tile).
    """
    n, _ = x_emb.shape
    hidden = params["w1"].shape[1]
    num_class = params["wl"].shape[1]

    if row_tile is None:
        row_tile = n
    if n % row_tile != 0 or row_tile % 8 != 0:
        row_tile = n                      # fall back to a single tile
    grid = (n // row_tile,)

    # ---- operand preparation: fusion + bf16 casts + lane padding ---------
    x_bf = x_emb.astype(jnp.bfloat16)
    a_bf = a_hat.astype(jnp.bfloat16)
    w_cat = jnp.concatenate([params["w1"], params["wf"]], axis=1).astype(jnp.bfloat16)
    b_f = params["bf"].astype(jnp.float32)
    w2_bf = params["w2"].astype(jnp.bfloat16)
    b12 = jnp.concatenate([params["b1"], params["b2"]], axis=1).astype(jnp.float32)
    wl_pad = jnp.zeros((hidden, LANE), jnp.float32).at[:, :num_class].set(
        params["wl"]).astype(jnp.bfloat16)
    bl_pad = jnp.full((1, LANE), -1e30, jnp.float32).at[:, :num_class].set(
        params["bl"])

    def full_spec(arr):
        nd = arr.ndim
        return pl.BlockSpec(arr.shape, lambda i, _nd=nd: (0,) * _nd)

    out_pad = pl.pallas_call(
        emb_gcn_kernel,
        out_shape=jax.ShapeDtypeStruct((n, LANE), jnp.float32),
        grid=grid,
        in_specs=[
            full_spec(x_bf),                                    # x (resident)
            pl.BlockSpec((row_tile, n), lambda i: (i, 0)),      # A_hat row tile
            full_spec(w_cat),
            full_spec(b_f),
            full_spec(w2_bf),
            full_spec(b12),
            full_spec(wl_pad),
            full_spec(bl_pad),
        ],
        out_specs=pl.BlockSpec((row_tile, LANE), lambda i: (i, 0)),
        compiler_params=pltpu.CompilerParams(
            dimension_semantics=("parallel",)),
    )(x_bf, a_bf, w_cat, b_f, w2_bf, b12, wl_pad, bl_pad)

    return out_pad[:, :num_class]


# ----------------------------- JAX glue & reference -----------------------------

def build_norm_adj(edge_index, edge_weight, num_nodes):
    """Dense equivalent of PyG gcn_norm with add_self_loops=True."""
    src = edge_index[0]
    dst = edge_index[1]
    loop = jnp.arange(num_nodes, dtype=edge_index.dtype)
    src = jnp.concatenate([src, loop])
    dst = jnp.concatenate([dst, loop])
    w = jnp.concatenate([edge_weight,
                         jnp.ones((num_nodes,), edge_weight.dtype)])
    deg = jnp.zeros((num_nodes,), jnp.float32).at[dst].add(w)
    dinv = jnp.where(deg > 0, 1.0 / jnp.sqrt(deg), 0.0)
    norm = dinv[src] * w * dinv[dst]
    # out[i] = sum_{edges j->i} norm * x[j]  =>  A_hat[i, j] += norm
    a_hat = jnp.zeros((num_nodes, num_nodes), jnp.float32).at[dst, src].add(norm)
    return a_hat


def emb_gcn_reference(x_emb, a_hat, params):
    """Pure-JAX fp32 reference of the eval-mode forward pass."""
    x1 = jax.nn.elu(a_hat @ (x_emb @ params["w1"]) + params["b1"])
    h = jax.nn.elu(x_emb @ params["wf"] + params["bf"])
    h = jax.nn.elu(a_hat @ (h @ params["w2"]) + params["b2"])
    logits = (x1 + h) @ params["wl"] + params["bl"]
    return jax.nn.log_softmax(logits, axis=-1)


def init_params(key, emb_dim, hidden, num_class, num_nodes):
    ks = jax.random.split(key, 9)
    scale = 0.1
    p = {
        # embedding table (lookup done in glue, like nn.Embedding)
        "emb_table": scale * jax.random.normal(ks[0], (num_nodes, emb_dim),
                                               jnp.float32),
        # GCNConv conv1: emb_dim -> hidden  (weight stored [in, out])
        "w1": scale * jax.random.normal(ks[1], (emb_dim, hidden), jnp.float32),
        "b1": scale * jax.random.normal(ks[2], (1, hidden), jnp.float32),
        # first_lin: emb_dim -> hidden
        "wf": scale * jax.random.normal(ks[3], (emb_dim, hidden), jnp.float32),
        "bf": scale * jax.random.normal(ks[4], (1, hidden), jnp.float32),
        # convs[0]: hidden -> hidden
        "w2": scale * jax.random.normal(ks[5], (hidden, hidden), jnp.float32),
        "b2": scale * jax.random.normal(ks[6], (1, hidden), jnp.float32),
        # lin2: hidden -> num_class
        "wl": scale * jax.random.normal(ks[7], (hidden, num_class), jnp.float32),
        "bl": scale * jax.random.normal(ks[8], (1, num_class), jnp.float32),
    }
    return p


# ----------------------------- main -----------------------------

if __name__ == "__main__":
    # module config: num_layers=2, hidden=32, emb_dim=64, num_class=2
    num_layers = 2
    hidden = max(32, 2 * 2)          # max(hidden, num_class*2) = 32
    emb_dim = 64
    num_class = 2
    num_nodes = 128                  # embedding table size == graph size
    num_edges = 256

    key = jax.random.PRNGKey(0)
    k_param, k_src, k_dst, k_w, k_perm = jax.random.split(key, 5)

    params = init_params(k_param, emb_dim, hidden, num_class, num_nodes)

    # synthetic graph data (data.edge_index, data.edge_weight, data.node_index)
    edge_src = jax.random.randint(k_src, (num_edges,), 0, num_nodes,
                                  dtype=jnp.int32)
    edge_dst = jax.random.randint(k_dst, (num_edges,), 0, num_nodes,
                                  dtype=jnp.int32)
    edge_index = jnp.stack([edge_src, edge_dst], axis=0)          # [2, E]
    edge_weight = jax.random.uniform(k_w, (num_edges,), jnp.float32,
                                     minval=0.1, maxval=1.0)      # [E]
    node_index = jax.random.permutation(k_perm,
                                        jnp.arange(num_nodes, dtype=jnp.int32))

    # glue: embedding lookup + dense normalized adjacency
    x_emb = params["emb_table"][node_index]                       # [N, emb_dim]
    a_hat = build_norm_adj(edge_index, edge_weight, num_nodes)    # [N, N]

    # single-tile path (default, best at this size) ...
    out = emb_gcn_forward(x_emb, a_hat, params)
    # ... and the row-tiled path (exercises the "parallel" grid / pipelining)
    out_tiled = emb_gcn_forward(x_emb, a_hat, params, row_tile=64)
    ref = emb_gcn_reference(x_emb, a_hat, params)
    out, out_tiled, ref = jax.block_until_ready((out, out_tiled, ref))

    assert out.shape == (num_nodes, num_class)
    assert out_tiled.shape == (num_nodes, num_class)
    assert jnp.all(jnp.isfinite(out))
    # log_softmax rows should (exp-)sum to ~1
    assert jnp.allclose(jnp.sum(jnp.exp(out), axis=-1), 1.0, atol=1e-4)
    # bf16-operand kernel vs fp32 pure-JAX reference
    assert jnp.allclose(out, ref, atol=3e-2, rtol=3e-2)
    assert jnp.allclose(out_tiled, ref, atol=3e-2, rtol=3e-2)

    print("KERNEL_OK")
</pallas_src>

<mosaic_0001>
module attributes {stable_mosaic.version = 11 : i64} {
  func.func @emb_gcn_kernel(%arg0: i32, %arg1: memref<128x64xbf16, #tpu.memory_space<vmem>>, %arg2: memref<128x128xbf16, #tpu.memory_space<vmem>>, %arg3: memref<64x64xbf16, #tpu.memory_space<vmem>>, %arg4: memref<1x32xf32, #tpu.memory_space<vmem>>, %arg5: memref<32x32xbf16, #tpu.memory_space<vmem>>, %arg6: memref<1x64xf32, #tpu.memory_space<vmem>>, %arg7: memref<32x128xbf16, #tpu.memory_space<vmem>>, %arg8: memref<1x128xf32, #tpu.memory_space<vmem>>, %arg9: memref<128x128xf32, #tpu.memory_space<vmem>>) attributes {dimension_semantics = [#tpu.dimension_semantics<parallel>], iteration_bounds = array<i64: 1>, scalar_prefetch = 0 : i64, scratch_operands = 0 : i64, tpu.core_type = #tpu.core_type<tc>, window_params = [{pipeline_mode = #tpu.pipeline_mode<synchronous>, transform_indices = @transform_0, window_bounds = array<i64: 128, 64>}, {transform_indices = @transform_1, window_bounds = array<i64: 128, 128>}, {pipeline_mode = #tpu.pipeline_mode<synchronous>, transform_indices = @transform_2, window_bounds = array<i64: 64, 64>}, {pipeline_mode = #tpu.pipeline_mode<synchronous>, transform_indices = @transform_3, window_bounds = array<i64: 1, 32>}, {pipeline_mode = #tpu.pipeline_mode<synchronous>, transform_indices = @transform_4, window_bounds = array<i64: 32, 32>}, {pipeline_mode = #tpu.pipeline_mode<synchronous>, transform_indices = @transform_5, window_bounds = array<i64: 1, 64>}, {pipeline_mode = #tpu.pipeline_mode<synchronous>, transform_indices = @transform_6, window_bounds = array<i64: 32, 128>}, {pipeline_mode = #tpu.pipeline_mode<synchronous>, transform_indices = @transform_7, window_bounds = array<i64: 1, 128>}, {transform_indices = @transform_8, window_bounds = array<i64: 128, 128>}]} {
    %c0 = arith.constant 0 : index
    %c0_0 = arith.constant 0 : index
    %0 = vector.load %arg1[%c0, %c0_0] : memref<128x64xbf16, #tpu.memory_space<vmem>>, vector<128x64xbf16>
    %c0_1 = arith.constant 0 : index
    %c0_2 = arith.constant 0 : index
    %1 = vector.load %arg2[%c0_1, %c0_2] : memref<128x128xbf16, #tpu.memory_space<vmem>>, vector<128x128xbf16>
    %c0_3 = arith.constant 0 : index
    %c0_4 = arith.constant 0 : index
    %2 = vector.load %arg3[%c0_3, %c0_4] : memref<64x64xbf16, #tpu.memory_space<vmem>>, vector<64x64xbf16>
    %cst = arith.constant dense<0.000000e+00> : vector<128x64xf32>
    %3 = tpu.matmul %0, %2, %cst {dimension_numbers = #tpu.dot_dimension_numbers<[1], [0], [0], [1], [0, 0, 1, 1], [], []>} : vector<128x64xbf16>, vector<64x64xbf16>, vector<128x64xf32> -> vector<128x64xf32>
    %4 = vector.extract_strided_slice %3 {offsets = [0, 0], sizes = [128, 32], strides = [1, 1]} : vector<128x64xf32> to vector<128x32xf32>
    %5 = vector.extract_strided_slice %3 {offsets = [0, 32], sizes = [128, 32], strides = [1, 1]} : vector<128x64xf32> to vector<128x32xf32>
    %c0_5 = arith.constant 0 : index
    %c0_6 = arith.constant 0 : index
    %6 = vector.load %arg4[%c0_5, %c0_6] : memref<1x32xf32, #tpu.memory_space<vmem>>, vector<1x32xf32>
    %7 = vector.broadcast %6 : vector<1x32xf32> to vector<128x32xf32>
    %8 = arith.addf %5, %7 : vector<128x32xf32>
    %cst_7 = arith.constant 0.000000e+00 : f32
    %9 = vector.broadcast %cst_7 : f32 to vector<128x32xf32>
    %10 = arith.cmpf ogt, %8, %9 : vector<128x32xf32>
    %cst_8 = arith.constant 0.000000e+00 : f32
    %11 = vector.broadcast %cst_8 : f32 to vector<128x32xf32>
    %12 = arith.minimumf %8, %11 : vector<128x32xf32>
    %13 = math.exp %12 : vector<128x32xf32>
    %cst_9 = arith.constant 1.000000e+00 : f32
    %14 = vector.broadcast %cst_9 : f32 to vector<128x32xf32>
    %15 = arith.subf %13, %14 : vector<128x32xf32>
    %16 = arith.select %10, %8, %15 : vector<128x32xi1>, vector<128x32xf32>
    %17 = arith.truncf %16 : vector<128x32xf32> to vector<128x32xbf16>
    %c0_10 = arith.constant 0 : index
    %c0_11 = arith.constant 0 : index
    %18 = vector.load %arg5[%c0_10, %c0_11] : memref<32x32xbf16, #tpu.memory_space<vmem>>, vector<32x32xbf16>
    %cst_12 = arith.constant dense<0.000000e+00> : vector<128x32xf32>
    %19 = tpu.matmul %17, %18, %cst_12 {dimension_numbers = #tpu.dot_dimension_numbers<[1], [0], [0], [1], [0, 0, 1, 1], [], []>} : vector<128x32xbf16>, vector<32x32xbf16>, vector<128x32xf32> -> vector<128x32xf32>
    %20 = tpu.concatenate %4, %19 in 1 : vector<128x32xf32>, vector<128x32xf32> -> vector<128x64xf32>
    %21 = arith.truncf %20 : vector<128x64xf32> to vector<128x64xbf16>
    %cst_13 = arith.constant dense<0.000000e+00> : vector<128x64xf32>
    %22 = tpu.matmul %1, %21, %cst_13 {dimension_numbers = #tpu.dot_dimension_numbers<[1], [0], [0], [1], [0, 0, 1, 1], [], []>} : vector<128x128xbf16>, vector<128x64xbf16>, vector<128x64xf32> -> vector<128x64xf32>
    %c0_14 = arith.constant 0 : index
    %c0_15 = arith.constant 0 : index
    %23 = vector.load %arg6[%c0_14, %c0_15] : memref<1x64xf32, #tpu.memory_space<vmem>>, vector<1x64xf32>
    %24 = vector.broadcast %23 : vector<1x64xf32> to vector<128x64xf32>
    %25 = arith.addf %22, %24 : vector<128x64xf32>
    %cst_16 = arith.constant 0.000000e+00 : f32
    %26 = vector.broadcast %cst_16 : f32 to vector<128x64xf32>
    %27 = arith.cmpf ogt, %25, %26 : vector<128x64xf32>
    %cst_17 = arith.constant 0.000000e+00 : f32
    %28 = vector.broadcast %cst_17 : f32 to vector<128x64xf32>
    %29 = arith.minimumf %25, %28 : vector<128x64xf32>
    %30 = math.exp %29 : vector<128x64xf32>
    %cst_18 = arith.constant 1.000000e+00 : f32
    %31 = vector.broadcast %cst_18 : f32 to vector<128x64xf32>
    %32 = arith.subf %30, %31 : vector<128x64xf32>
    %33 = arith.select %27, %25, %32 : vector<128x64xi1>, vector<128x64xf32>
    %34 = vector.extract_strided_slice %33 {offsets = [0, 0], sizes = [128, 32], strides = [1, 1]} : vector<128x64xf32> to vector<128x32xf32>
    %35 = vector.extract_strided_slice %33 {offsets = [0, 32], sizes = [128, 32], strides = [1, 1]} : vector<128x64xf32> to vector<128x32xf32>
    %36 = arith.addf %34, %35 : vector<128x32xf32>
    %37 = arith.truncf %36 : vector<128x32xf32> to vector<128x32xbf16>
    %c0_19 = arith.constant 0 : index
    %c0_20 = arith.constant 0 : index
    %38 = vector.load %arg7[%c0_19, %c0_20] : memref<32x128xbf16, #tpu.memory_space<vmem>>, vector<32x128xbf16>
    %cst_21 = arith.constant dense<0.000000e+00> : vector<128x128xf32>
    %39 = tpu.matmul %37, %38, %cst_21 {dimension_numbers = #tpu.dot_dimension_numbers<[1], [0], [0], [1], [0, 0, 1, 1], [], []>} : vector<128x32xbf16>, vector<32x128xbf16>, vector<128x128xf32> -> vector<128x128xf32>
    %c0_22 = arith.constant 0 : index
    %c0_23 = arith.constant 0 : index
    %40 = vector.load %arg8[%c0_22, %c0_23] : memref<1x128xf32, #tpu.memory_space<vmem>>, vector<1x128xf32>
    %41 = vector.broadcast %40 : vector<1x128xf32> to vector<128x128xf32>
    %42 = arith.addf %39, %41 : vector<128x128xf32>
    %cst_24 = arith.constant dense<0xFF800000> : vector<128xf32>
    %43 = vector.multi_reduction <maximumf>, %42, %cst_24 [1] : vector<128x128xf32> to vector<128xf32>
    %44 = vector.shape_cast %43 : vector<128xf32> to vector<128x1xf32>
    %45 = vector.broadcast %44 : vector<128x1xf32> to vector<128x128xf32>
    %46 = arith.subf %42, %45 : vector<128x128xf32>
    %47 = math.exp %46 : vector<128x128xf32>
    %cst_25 = arith.constant dense<0.000000e+00> : vector<128xf32>
    %48 = vector.multi_reduction <add>, %47, %cst_25 [1] : vector<128x128xf32> to vector<128xf32>
    %49 = vector.shape_cast %48 : vector<128xf32> to vector<128x1xf32>
    %50 = math.log %49 : vector<128x1xf32>
    %51 = vector.broadcast %50 : vector<128x1xf32> to vector<128x128xf32>
    %52 = arith.subf %46, %51 : vector<128x128xf32>
    %c0_26 = arith.constant 0 : index
    %c0_27 = arith.constant 0 : index
    %53 = vector.load %arg9[%c0_26, %c0_27] : memref<128x128xf32, #tpu.memory_space<vmem>>, vector<128x128xf32>
    tpu.vector_store %arg9[%c0_26, %c0_27], %52 {strides = array<i32>} : memref<128x128xf32, #tpu.memory_space<vmem>>, vector<128x128xf32>,
    return
  }
  func.func @transform_0(%arg0: i32) -> (i32, i32) {
    %c0_i32 = arith.constant 0 : i32
    %c0_i32_0 = arith.constant 0 : i32
    %c0_i32_1 = arith.constant 0 : i32
    return %c0_i32, %c0_i32_0 : i32, i32
  }
  func.func @transform_1(%arg0: i32) -> (i32, i32) {
    %c0_i32 = arith.constant 0 : i32
    %c0_i32_0 = arith.constant 0 : i32
    return %arg0, %c0_i32 : i32, i32
  }
  func.func @transform_2(%arg0: i32) -> (i32, i32) {
    %c0_i32 = arith.constant 0 : i32
    %c0_i32_0 = arith.constant 0 : i32
    %c0_i32_1 = arith.constant 0 : i32
    return %c0_i32, %c0_i32_0 : i32, i32
  }
  func.func @transform_3(%arg0: i32) -> (i32, i32) {
    %c0_i32 = arith.constant 0 : i32
    %c0_i32_0 = arith.constant 0 : i32
    %c0_i32_1 = arith.constant 0 : i32
    return %c0_i32, %c0_i32_0 : i32, i32
  }
  func.func @transform_4(%arg0: i32) -> (i32, i32) {
    %c0_i32 = arith.constant 0 : i32
    %c0_i32_0 = arith.constant 0 : i32
    %c0_i32_1 = arith.constant 0 : i32
    return %c0_i32, %c0_i32_0 : i32, i32
  }
  func.func @transform_5(%arg0: i32) -> (i32, i32) {
    %c0_i32 = arith.constant 0 : i32
    %c0_i32_0 = arith.constant 0 : i32
    %c0_i32_1 = arith.constant 0 : i32
    return %c0_i32, %c0_i32_0 : i32, i32
  }
  func.func @transform_6(%arg0: i32) -> (i32, i32) {
    %c0_i32 = arith.constant 0 : i32
    %c0_i32_0 = arith.constant 0 : i32
    %c0_i32_1 = arith.constant 0 : i32
    return %c0_i32, %c0_i32_0 : i32, i32
  }
  func.func @transform_7(%arg0: i32) -> (i32, i32) {
    %c0_i32 = arith.constant 0 : i32
    %c0_i32_0 = arith.constant 0 : i32
    %c0_i32_1 = arith.constant 0 : i32
    return %c0_i32, %c0_i32_0 : i32, i32
  }
  func.func @transform_8(%arg0: i32) -> (i32, i32) {
    %c0_i32 = arith.constant 0 : i32
    %c0_i32_0 = arith.constant 0 : i32
    return %arg0, %c0_i32 : i32, i32
  }
}

</mosaic_0001>

<bundles_post_ra>
// kernel: tpu_custom_call.1
= control target key start
LH: loop header
LB: loop body
LE: loop exit
PB: predicated region body
PF: predicated region fallthrough
CT: control target
= control target key end

     0   :  { %13 = vsyncpa [#allocation3], 0  ;;  %s2370_s0 = inlined_call_operand.vmem [shape: bf16[128,64], index: 0, kind: input, shape index: {}]   ;;  %s2371_s1 = inlined_call_operand.vmem [shape: bf16[128,128], index: 1, kind: input, shape index: {}]   ;;  %s2372_s2 = inlined_call_operand.vmem [shape: bf16[64,64], index: 2, kind: input, shape index: {}]   ;;  %s2373_s3 = inlined_call_operand.vmem [shape: f32[1,32], index: 3, kind: input, shape index: {}]   ;;  %s2374_s4 = inlined_call_operand.hbm [shape: bf16[32,32], index: 4, kind: input, shape index: {}]   ;;  %s2375_s5 = inlined_call_operand.vmem [shape: f32[1,64], index: 5, kind: input, shape index: {}]   ;;  %s2376_s6 = inlined_call_operand.vmem [shape: bf16[32,128], index: 6, kind: input, shape index: {}]   ;;  %s2377_s7 = inlined_call_operand.vmem [shape: f32[1,128], index: 7, kind: input, shape index: {}]   ;;  %s2378_s8 = inlined_call_operand.hbm [shape: f32[128,128], index: 8, kind: output, shape index: {}]  }
   0x1   :  { %14 = vsyncpa [#allocation4], 0  ;;  %s1798_s27 = smov [#allocation2]   ;;  %s1750_s9 = scalar_lea.hbm %s2374_s4, 256 }
   0x2   :  { %s28_s28 = sshll.u32 %s1798_s27, 4  ;;  %p1751_p0 = scmp.ne.s32.totalorder %s2374_s4, %s1750_s9  ;;  %s29_s28 = int_to_ptr.vmem [resolvable:$true] %s28_s28 }
   0x3   :  { %p1754_p1 = scmp.lt.u32.totalorder %s1750_s9, %s2374_s4 }
   0x5   :  { %p1756_p2 = pnand %p1754_p1, %p1751_p0 }
   0x7   :  { %1759 = shalt.err (!%p1756_p2)
}
   0x8   :  { %s1760_s14 = scalar_lea.vmem %s29_s28, 256  ;;  %p1765_p4 = scmp.lt.s32.totalorder %s29_s28, %s29_s28 }
   0x9   :  { %p1761_p3 = scmp.ne.s32.totalorder %s29_s28, %s1760_s14  ;;  %p1766_p5 = scmp.lt.s32.totalorder %s1760_s14, %s1760_s14 }
   0xb   :  { %p1767_p6 = por %p1766_p5, %p1765_p4 }
   0xd   :  { %p1768_p7 = pnand %p1767_p6, %p1761_p3 }
   0xf   :  { %1771 = shalt.err (!%p1768_p7)
}
  0x10   :  { %s1799_s15 = smov 64   ;;  %s1800_s16 = smov 4  }
  0x11   :  { %34 = dma.hbm_to_vmem [thread:$0]  %s2374_s4, 256, %s29_s28, [#allocation3], %s1799_s15, %s1799_s15, %s1800_s16  }
  0x12   :  { %1794 = dma.done.wait [#allocation3], 256  }
  0x13   :  { %1795 = vsyncadd [#allocation3], 4294967040  ;;  %v1598_v0 = vld [vmem:[%s2372_s2] sm:$0xff]   ;;  %v1599_v1 = vld [vmem:[%s2372_s2 + $0x8] sm:$0xff]   ;;  %vm149_vm0 = vcmask 523264   ;;  %s1801_s12 = smov 32  }
  0x14   :  { %1454 = vmatprep.subr.bf16.mxu0 %v1598_v0  ;;  %v1600_v2 = vld [vmem:[%s2372_s2 + $0x10] sm:$0xff]   ;;  %v1602_v3 = vld [vmem:[%s2370_s0] sm:$0xff]   ;;  %v1601_v4 = vld [vmem:[%s2372_s2 + $0x18] sm:$0xff]  }
  0x15   :  { %1455 = vmatpush3.bf16.msra.mxu0 %v1598_v0  ;;  %1462 = vmatprep.mubr.msk.bf16.mxu0 %vm149_vm0, %v1602_v3  ;;  %v1603_v5 = vld [vmem:[%s2370_s0 + $0x8] sm:$0xff]   ;;  %v1343_v6 = vld [vmem:[%s2373_s3] ss:$0 sm:$0xff]  ;;  %v1604_v7 = vld [vmem:[%s2370_s0 + $0x10] sm:$0xff]  }
  0x16   :  { %1456 = vmatprep.subr.bf16.mxu0 %v1599_v1  ;;  %277 = vrot.lane.b32.xlu0 %v1343_v6, %s1801_s12  ;;  %v1605_v8 = vld [vmem:[%s2370_s0 + $0x18] sm:$0xff]   ;;  %v1606_v9 = vld [vmem:[%s2370_s0 + $0x20] sm:$0xff]   ;;  %v1607_v10 = vld [vmem:[%s2370_s0 + $0x28] sm:$0xff]  }
  0x17   :  { %v1608_v11 = vld [vmem:[%s2370_s0 + $0x30] sm:$0xff]   ;;  %v1609_v12 = vld [vmem:[%s2370_s0 + $0x38] sm:$0xff]   ;;  %v1610_v13 = vld [vmem:[#allocation2] sm:$0xff]   ;;  %s1802_s0 = smov 96  }
  0x18   :  { %v1611_v14 = vld [vmem:[#allocation2 + $0x8] sm:$0xff]   ;;  %1478 = vmatprep.subr.bf16.mxu1 %v1610_v13 }
  0x19   :  { %1457 = vmatpush3.bf16.msra.mxu0 %v1599_v1  ;;  %1479 = vmatpush3.bf16.msra.mxu1 %v1610_v13 }
  0x1a   :  { %1458 = vmatprep.subr.bf16.mxu0 %v1600_v2  ;;  %1480 = vmatprep.subr.bf16.mxu1 %v1611_v14 }
  0x1d   :  { %1459 = vmatpush3.bf16.msra.mxu0 %v1600_v2  ;;  %1481 = vmatpush3.bf16.msra.mxu1 %v1611_v14 }
  0x1e   :  { %1460 = vmatprep.subr.bf16.mxu0 %v1601_v4 }
  0x21   :  { %1461 = vmatpush3.bf16.msra.mxu0 %v1601_v4 }
  0x24   :  { %1463 = vmatmul.mubr.msk.bf16.vlgmr.msra.gmra.mrb[0].mxu0 %vm149_vm0, %v1603_v5 }
  0x25   :  { %1466 = vmatprep.mubr.msk.bf16.mxu0 %vm149_vm0, %v1604_v7 }
  0x2c   :  { %1467 = vmatmul.mubr.msk.bf16.gmra.mrb[4].mxu0 %vm149_vm0, %v1605_v8 }
  0x2d   :  { %1470 = vmatprep.mubr.msk.bf16.mxu0 %vm149_vm0, %v1606_v9 }
  0x34   :  { %1471 = vmatmul.mubr.msk.bf16.gmra.mrb[8].mxu0 %vm149_vm0, %v1607_v10 }
  0x35   :  { %1474 = vmatprep.mubr.msk.bf16.mxu0 %vm149_vm0, %v1608_v11 }
  0x3c   :  { %1475 = vmatmul.mubr.msk.bf16.gmra.mrb[12].mxu0 %vm149_vm0, %v1609_v12 }
  0x88   :  { %v1911_v15 = vpop.permute.xlu0 %277 }
  0xf7   :  { %v1913_v16 = vpop.f32.mrb[0].mxu0 }
  0xf8   :  { %v1917_v17 = vadd.f32 %v1913_v16, %v1911_v15  ;;  %v1919_v18 = vpop.f32.mrb[1].mxu0 }
  0xf9   :  { %v1923_v19 = vadd.f32 %v1911_v15, %v1919_v18  ;;  %v1925_v20 = vpop.f32.mrb[2].mxu0 }
  0xfa   :  { %v314_v21 = vmin.f32 %v1917_v17, 0.0  ;;  %v283_v22 = vadd.f32 %v1925_v20, %v1911_v15  ;;  %v1930_v23 = vpop.f32.mrb[3].mxu0  ;;  %vm298_vm1 = vcmp.gt.f32.partialorder %v1917_v17, 0.0 }
  0xfb   :  { %v312_v24 = vmin.f32 %v1923_v19, 0.0  ;;  %v1935_v25 = vadd.f32 %v1911_v15, %v1930_v23  ;;  %vm296_vm3 = vcmp.gt.f32.partialorder %v1923_v19, 0.0 }
  0xfc   :  { %v332_v26 = vmul.f32 1.442695, %v314_v21  ;;  %v315_v27 = vmin.f32 %v283_v22, 0.0  ;;  %vm299_vm2 = vcmp.gt.f32.partialorder %v283_v22, 0.0 }
  0xfd   :  { %v328_v28 = vmul.f32 1.442695, %v312_v24  ;;  %v313_v29 = vmin.f32 %v1935_v25, 0.0  ;;  %vm297_vm4 = vcmp.gt.f32.partialorder %v1935_v25, 0.0 }
  0xfe   :  { %1622 = vpow2.f32 %v332_v26  ;;  %v334_v30 = vmul.f32 1.442695, %v315_v27 }
  0xff   :  { %1624 = vpow2.f32 %v328_v28  ;;  %v330_v31 = vmul.f32 1.442695, %v313_v29  ;;  %v1938_v32 = vpop.f32.mrb[4].mxu0 }
 0x100   :  { %1626 = vpow2.f32 %v334_v30  ;;  %v1942_v33 = vadd.f32 %v1938_v32, %v1911_v15  ;;  %v1944_v34 = vpop.f32.mrb[5].mxu0 }
 0x101   :  { %1628 = vpow2.f32 %v330_v31  ;;  %v1948_v35 = vadd.f32 %v1911_v15, %v1944_v34  ;;  %v1950_v36 = vpop.f32.mrb[6].mxu0 }
 0x102   :  { %v318_v37 = vmin.f32 %v1942_v33, 0.0  ;;  %v1955_v38 = vadd.f32 %v1950_v36, %v1911_v15  ;;  %v1957_v39 = vpop.f32.mrb[7].mxu0  ;;  %vm302_vm5 = vcmp.gt.f32.partialorder %v1942_v33, 0.0 }
 0x103   :  { %v316_v40 = vmin.f32 %v1948_v35, 0.0  ;;  %v1962_v41 = vadd.f32 %v1911_v15, %v1957_v39  ;;  %vm300_vm7 = vcmp.gt.f32.partialorder %v1948_v35, 0.0 }
 0x104   :  { %v340_v42 = vmul.f32 1.442695, %v318_v37  ;;  %v319_v43 = vmin.f32 %v1955_v38, 0.0  ;;  %vm303_vm6 = vcmp.gt.f32.partialorder %v1955_v38, 0.0 }
 0x105   :  { %v336_v44 = vmul.f32 1.442695, %v316_v40  ;;  %v317_v45 = vmin.f32 %v1962_v41, 0.0  ;;  %vm301_vm8 = vcmp.gt.f32.partialorder %v1962_v41, 0.0 }
 0x106   :  { %1630 = vpow2.f32 %v340_v42  ;;  %v342_v46 = vmul.f32 1.442695, %v319_v43 }
 0x107   :  { %1632 = vpow2.f32 %v336_v44  ;;  %v338_v47 = vmul.f32 1.442695, %v317_v45  ;;  %v1966_v48 = vpop.f32.mrb[8].mxu0 }
 0x108   :  { %v1623_v49 = vpop.eup %1622  ;;  %1634 = vpow2.f32 %v342_v46  ;;  %v1970_v50 = vadd.f32 %v1966_v48, %v1911_v15  ;;  %v1972_v51 = vpop.f32.mrb[9].mxu0 }
 0x109   :  { %v1625_v52 = vpop.eup %1624  ;;  %1636 = vpow2.f32 %v338_v47  ;;  %v1976_v53 = vadd.f32 %v1911_v15, %v1972_v51  ;;  %v1978_v54 = vpop.f32.mrb[10].mxu0  ;;  %v1346_v55 = vadd.f32 -1.0, %v1623_v49 }
 0x10a   :  { %v1627_v56 = vpop.eup %1626  ;;  %v322_v57 = vmin.f32 %v1970_v50, 0.0  ;;  %v1983_v58 = vadd.f32 %v1978_v54, %v1911_v15  ;;  %v1985_v59 = vpop.f32.mrb[11].mxu0  ;;  %v1344_v2 = vadd.f32 -1.0, %v1625_v52  ;;  %vm306_vm9 = vcmp.gt.f32.partialorder %v1970_v50, 0.0 }
 0x10b   :  { %v1629_v60 = vpop.eup %1628  ;;  %v320_v61 = vmin.f32 %v1976_v53, 0.0  ;;  %v1990_v62 = vadd.f32 %v1911_v15, %v1985_v59  ;;  %v1347_v63 = vadd.f32 -1.0, %v1627_v56  ;;  %v378_v5 = vsel %vm298_vm1, %v1917_v17, %v1346_v55 }
 0x10c   :  { %v348_v0 = vmul.f32 1.442695, %v322_v57  ;;  %v323_v1 = vmin.f32 %v1983_v58, 0.0  ;;  %v1345_v9 = vadd.f32 -1.0, %v1629_v60  ;;  %v376_v17 = vsel %vm296_vm3, %v1923_v19, %v1344_v2 }
 0x10d   :  { %v344_v3 = vmul.f32 1.442695, %v320_v61  ;;  %v321_v4 = vmin.f32 %v1990_v62, 0.0  ;;  %v379_v6 = vsel %vm299_vm2, %v283_v22, %v1347_v63  ;;  %vm307_vm10 = vcmp.gt.f32.partialorder %v1983_v58, 0.0 }
 0x10e   :  { %1638 = vpow2.f32 %v348_v0  ;;  %v350_v7 = vmul.f32 1.442695, %v323_v1  ;;  %v393_v8 = vpack.c.bf16 %v379_v6, %v378_v5  ;;  %v377_v21 = vsel %vm297_vm4, %v1935_v25, %v1345_v9 }
 0x10f   :  { %1640 = vpow2.f32 %v344_v3  ;;  %v346_v10 = vmul.f32 1.442695, %v321_v4  ;;  %v1998_v11 = vpop.f32.mrb[12].mxu0  ;;  %v392_v26 = vpack.c.bf16 %v377_v21, %v376_v17  ;;  %vm304_vm11 = vcmp.gt.f32.partialorder %v1976_v53, 0.0 }
 0x110   :  { %v1631_v12 = vpop.eup %1630  ;;  %1642 = vpow2.f32 %v350_v7  ;;  %v2002_v13 = vadd.f32 %v1998_v11, %v1911_v15  ;;  %414 = vrot.lane.b32.xlu1 %v393_v8, %s1802_s0  ;;  %v2005_v14 = vpop.f32.mrb[13].mxu0  ;;  %vm305_vm12 = vcmp.gt.f32.partialorder %v1990_v62, 0.0  ;;  %vm440_vm1 = vcmask 261120  }
 0x111   :  { %v1633_v22 = vpop.eup %1632  ;;  %1644 = vpow2.f32 %v346_v10  ;;  %v2011_v24 = vadd.f32 %v1911_v15, %v2005_v14  ;;  %v2013_v27 = vpop.f32.mrb[14].mxu0  ;;  %v1350_v28 = vadd.f32 -1.0, %v1631_v12  ;;  %412 = vrot.lane.b32.xlu0 %v392_v26, %s1802_s0 }
 0x112   :  { %v1635_v29 = vpop.eup %1634  ;;  %v326_v30 = vmin.f32 %v2002_v13, 0.0  ;;  %v2018_v31 = vadd.f32 %v2013_v27, %v1911_v15  ;;  %v2020_v19 = vpop.f32.mrb[15].mxu0  ;;  %v1348_v45 = vadd.f32 -1.0, %v1633_v22  ;;  %vm310_vm13 = vcmp.gt.f32.partialorder %v2002_v13, 0.0 }
 0x113   :  { %v1637_v25 = vpop.eup %1636  ;;  %v324_v37 = vmin.f32 %v2011_v24, 0.0  ;;  %v293_v40 = vadd.f32 %v1911_v15, %v2020_v19  ;;  %v1351_v42 = vadd.f32 -1.0, %v1635_v29  ;;  %v382_v49 = vsel %vm302_vm5, %v1942_v33, %v1350_v28 }
 0x114   :  { %v356_v43 = vmul.f32 1.442695, %v326_v30  ;;  %v327_v44 = vmin.f32 %v2018_v31, 0.0  ;;  %v1349_v57 = vadd.f32 -1.0, %v1637_v25  ;;  %v380_v61 = vsel %vm300_vm7, %v1948_v35, %v1348_v45 }
 0x115   :  { %v352_v46 = vmul.f32 1.442695, %v324_v37  ;;  %v325_v47 = vmin.f32 %v293_v40, 0.0  ;;  %v383_v52 = vsel %vm303_vm6, %v1955_v38, %v1351_v42  ;;  %vm311_vm14 = vcmp.gt.f32.partialorder %v2018_v31, 0.0 }
 0x116   :  { %1646 = vpow2.f32 %v356_v43  ;;  %v358_v55 = vmul.f32 1.442695, %v327_v44  ;;  %v395_v56 = vpack.c.bf16 %v383_v52, %v382_v49  ;;  %v381_v33 = vsel %vm301_vm8, %v1962_v41, %v1349_v57 }
 0x117   :  { %1648 = vpow2.f32 %v352_v46  ;;  %v354_v15 = vmul.f32 1.442695, %v325_v47  ;;  %v394_v38 = vpack.c.bf16 %v381_v33, %v380_v61  ;;  %vm308_vm15 = vcmp.gt.f32.partialorder %v2011_v24, 0.0 }
 0x118   :  { %v1639_v60 = vpop.eup %1638  ;;  %1650 = vpow2.f32 %v358_v55  ;;  %418 = vrot.lane.b32.xlu0 %v395_v56, %s1802_s0  ;;  %vm309_vm0 = vcmp.gt.f32.partialorder %v293_v40, 0.0 }
 0x119   :  { %v1641_v63 = vpop.eup %1640  ;;  %1652 = vpow2.f32 %v354_v15  ;;  %v1354_v0 = vadd.f32 -1.0, %v1639_v60  ;;  %416 = vrot.lane.b32.xlu1 %v394_v38, %s1802_s0 }
 0x11a   :  { %v1643_v1 = vpop.eup %1642  ;;  %v1352_v2 = vadd.f32 -1.0, %v1641_v63 }
 0x11b   :  { %v1645_v3 = vpop.eup %1644  ;;  %v1355_v4 = vadd.f32 -1.0, %v1643_v1  ;;  %v386_v35 = vsel %vm306_vm9, %v1970_v50, %v1354_v0 }
 0x11c   :  { %v1353_v5 = vadd.f32 -1.0, %v1645_v3  ;;  %v384_v7 = vsel %vm304_vm11, %v1976_v53, %v1352_v2 }
 0x11d   :  { %v387_v41 = vsel %vm307_vm10, %v1983_v58, %v1355_v4 }
 0x11e   :  { %v397_v6 = vpack.c.bf16 %v387_v41, %v386_v35  ;;  %v385_v8 = vsel %vm305_vm12, %v1990_v62, %v1353_v5 }
 0x11f   :  { %v396_v9 = vpack.c.bf16 %v385_v8, %v384_v7  ;;  %v1612_v7 = vld [vmem:[%s2371_s1] sm:$0xff]  }
 0x120   :  { %v1647_v10 = vpop.eup %1646  ;;  %422 = vrot.lane.b32.xlu0 %v397_v6, %s1802_s0 }
 0x121   :  { %v1649_v12 = vpop.eup %1648  ;;  %420 = vrot.lane.b32.xlu1 %v396_v9, %s1802_s0  ;;  %v1358_v17 = vadd.f32 -1.0, %v1647_v10 }
 0x122   :  { %v1651_v21 = vpop.eup %1650  ;;  %v1356_v22 = vadd.f32 -1.0, %v1649_v12 }
 0x123   :  { %v1653_v26 = vpop.eup %1652  ;;  %v1359_v28 = vadd.f32 -1.0, %v1651_v21  ;;  %v390_v53 = vsel %vm310_vm13, %v2002_v13, %v1358_v17 }
 0x124   :  { %v1357_v50 = vadd.f32 -1.0, %v1653_v26  ;;  %v388_v29 = vsel %vm308_vm15, %v2011_v24, %v1356_v22 }
 0x125   :  { %v391_v58 = vsel %vm311_vm14, %v2018_v31, %v1359_v28 }
 0x126   :  { %v399_v62 = vpack.c.bf16 %v391_v58, %v390_v53  ;;  %v389_v30 = vsel %vm309_vm0, %v293_v40, %v1357_v50 }
 0x127   :  { %v398_v25 = vpack.c.bf16 %v389_v30, %v388_v29 }
 0x128   :  { %426 = vrot.lane.b32.xlu0 %v399_v62, %s1802_s0 }
 0x129   :  { %424 = vrot.lane.b32.xlu1 %v398_v25, %s1802_s0 }
 0x182   :  { %v415_v42 = vpop.permute.xlu1 %414 }
 0x183   :  { %v413_v37 = vpop.permute.xlu0 %412 }
 0x184   :  { %1482 = vmatprep.mubr.msk.bf16.mxu1 %vm440_vm1, %v413_v37 }
 0x185   :  { %1483 = vmatmul.mubr.msk.bf16.vlgmr.msra.gmra.mrb[0].mxu1 %vm440_vm1, %v415_v42 }
 0x18a   :  { %v419_v13 = vpop.permute.xlu0 %418 }
 0x18b   :  { %v417_v43 = vpop.permute.xlu1 %416 }
 0x18c   :  { %1486 = vmatprep.mubr.msk.bf16.mxu1 %vm440_vm1, %v417_v43 }
 0x18d   :  { %1487 = vmatmul.mubr.msk.bf16.gmra.mrb[4].mxu1 %vm440_vm1, %v419_v13 }
 0x192   :  { %v423_v31 = vpop.permute.xlu0 %422 }
 0x193   :  { %v421_v24 = vpop.permute.xlu1 %420 }
 0x194   :  { %1490 = vmatprep.mubr.msk.bf16.mxu1 %vm440_vm1, %v421_v24 }
 0x195   :  { %1491 = vmatmul.mubr.msk.bf16.gmra.mrb[8].mxu1 %vm440_vm1, %v423_v31 }
 0x19a   :  { %v427_v44 = vpop.permute.xlu0 %426 }
 0x19b   :  { %v425_v40 = vpop.permute.xlu1 %424 }
 0x19c   :  { %1494 = vmatprep.mubr.msk.bf16.mxu1 %vm440_vm1, %v425_v40 }
 0x19d   :  { %1495 = vmatmul.mubr.msk.bf16.gmra.mrb[12].mxu1 %vm440_vm1, %v427_v44 }
 0x19e   :  { %1514 = vmatprep.mubr.bf16.mxu1 %v1612_v7 }
 0x258   :  { %v1484_v45 = vpop.f32.mrb[0].mxu1 }
 0x259   :  { %v499_v46 = vpop.f32.mrb[1].mxu1 }
 0x25a   :  { %v1485_v47 = vpop.f32.mrb[2].mxu1 }
 0x25b   :  { %v1563_v49 = vpack.i.bf16 %v1485_v47, %v1484_v45  ;;  %v502_v52 = vpop.f32.mrb[3].mxu1 }
 0x25c   :  { %v1558_v55 = vpack.i.bf16 %v502_v52, %v499_v46 }
 0x25d   :  { %1564 = vrot.lane.b32.xlu0 %v1563_v49, %s1801_s12 }
 0x25e   :  { %1559 = vrot.lane.b32.xlu1 %v1558_v55, %s1801_s12 }
 0x260   :  { %v1488_v56 = vpop.f32.mrb[4].mxu1 }
 0x261   :  { %v515_v57 = vpop.f32.mrb[5].mxu1 }
 0x262   :  { %v1489_v15 = vpop.f32.mrb[6].mxu1 }
 0x263   :  { %v1573_v60 = vpack.i.bf16 %v1489_v15, %v1488_v56  ;;  %v518_v61 = vpop.f32.mrb[7].mxu1 }
 0x264   :  { %v1568_v33 = vpack.i.bf16 %v518_v61, %v515_v57 }
 0x265   :  { %1574 = vrot.lane.b32.xlu0 %v1573_v60, %s1801_s12 }
 0x266   :  { %1569 = vrot.lane.b32.xlu1 %v1568_v33, %s1801_s12 }
 0x268   :  { %v1492_v63 = vpop.f32.mrb[8].mxu1 }
 0x269   :  { %v531_v38 = vpop.f32.mrb[9].mxu1 }
 0x26a   :  { %v1493_v0 = vpop.f32.mrb[10].mxu1 }
 0x26b   :  { %v1583_v1 = vpack.i.bf16 %v1493_v0, %v1492_v63  ;;  %v534_v2 = vpop.f32.mrb[11].mxu1  ;;  %v1618_v0 = vld [vmem:[%s2371_s1 + $0x30] sm:$0xff]  }
 0x26c   :  { %v1578_v3 = vpack.i.bf16 %v534_v2, %v531_v38  ;;  %v1613_v38 = vld [vmem:[%s2371_s1 + $0x8] sm:$0xff]   ;;  %v1620_v2 = vld [vmem:[%s2376_s6] sm:$0xff]  }
 0x26d   :  { %1584 = vrot.lane.b32.xlu0 %v1583_v1, %s1801_s12  ;;  %v1619_v1 = vld [vmem:[%s2371_s1 + $0x38] sm:$0xff]   ;;  %1530 = vmatprep.subr.bf16.mxu0 %v1620_v2 }
 0x26e   :  { %1579 = vrot.lane.b32.xlu1 %v1578_v3, %s1801_s12  ;;  %v1621_v3 = vld [vmem:[%s2376_s6 + $0x8] sm:$0xff]   ;;  %1531 = vmatpush3.bf16.msra.mxu0 %v1620_v2  ;;  %s1803_s6 = smov [#allocation5]  }
 0x26f   :  { %1532 = vmatprep.subr.bf16.mxu0 %v1621_v3 }
 0x270   :  { %v1496_v4 = vpop.f32.mrb[12].mxu1 }
 0x271   :  { %v547_v5 = vpop.f32.mrb[13].mxu1 }
 0x272   :  { %v1497_v35 = vpop.f32.mrb[14].mxu1  ;;  %1533 = vmatpush3.bf16.msra.mxu0 %v1621_v3 }
 0x273   :  { %v1593_v41 = vpack.i.bf16 %v1497_v35, %v1496_v4  ;;  %v550_v6 = vpop.f32.mrb[15].mxu1  ;;  %v2136_v4 = vld [vmem:[%s2375_s5] ss:$0 sm:$0xff] }
 0x274   :  { %v1588_v8 = vpack.i.bf16 %v550_v6, %v547_v5 }
 0x275   :  { %1594 = vrot.lane.b32.xlu0 %v1593_v41, %s1801_s12 }
 0x276   :  { %1589 = vrot.lane.b32.xlu1 %v1588_v8, %s1801_s12 }
 0x2cf   :  { %v1565_v9 = vpop.permute.xlu0 %1564 }
 0x2d0   :  { %v1567_v10 = vunpack.i.h.bf16 %v1565_v9  ;;  %v1566_v12 = vunpack.i.l.bf16 %v1565_v9  ;;  %v1560_v17 = vpop.permute.xlu1 %1559 }
 0x2d1   :  { %v1562_v21 = vunpack.i.h.bf16 %v1560_v17  ;;  %v1561_v22 = vunpack.i.l.bf16 %v1560_v17 }
 0x2d2   :  { %v628_v26 = vsel %vm440_vm1, %v1913_v16, %v1566_v12  ;;  %v629_v28 = vsel %vm440_vm1, %v1925_v20, %v1567_v10 }
 0x2d3   :  { %v626_v50 = vsel %vm440_vm1, %v1919_v18, %v1561_v22  ;;  %v627_v53 = vsel %vm440_vm1, %v1930_v23, %v1562_v21  ;;  %v643_v58 = vpack.c.bf16 %v629_v28, %v628_v26 }
 0x2d4   :  { %v642_v62 = vpack.c.bf16 %v627_v53, %v626_v50 }
 0x2d6   :  { %1498 = vmatprep.subr.bf16.mxu1 %v642_v62 }
 0x2d7   :  { %v1575_v29 = vpop.permute.xlu0 %1574  ;;  %1499 = vmatpush3.bf16.msra.mxu1 %v642_v62 }
 0x2d8   :  { %v1577_v30 = vunpack.i.h.bf16 %v1575_v29  ;;  %v1576_v25 = vunpack.i.l.bf16 %v1575_v29  ;;  %v1570_v37 = vpop.permute.xlu1 %1569  ;;  %1500 = vmatprep.subr.bf16.mxu1 %v643_v58 }
 0x2d9   :  { %v1572_v42 = vunpack.i.h.bf16 %v1570_v37  ;;  %v1571_v16 = vunpack.i.l.bf16 %v1570_v37 }
 0x2da   :  { %v632_v20 = vsel %vm440_vm1, %v1938_v32, %v1576_v25  ;;  %v633_v18 = vsel %vm440_vm1, %v1950_v36, %v1577_v30 }
 0x2db   :  { %1501 = vmatpush3.bf16.msra.mxu1 %v643_v58  ;;  %v630_v23 = vsel %vm440_vm1, %v1944_v34, %v1571_v16  ;;  %v631_v43 = vsel %vm440_vm1, %v1957_v39, %v1572_v42  ;;  %v645_v13 = vpack.c.bf16 %v633_v18, %v632_v20 }
 0x2dc   :  { %v644_v24 = vpack.c.bf16 %v631_v43, %v630_v23 }
 0x2de   :  { %1502 = vmatprep.subr.bf16.mxu1 %v644_v24 }
 0x2df   :  { %v1585_v31 = vpop.permute.xlu0 %1584  ;;  %1503 = vmatpush3.bf16.msra.mxu1 %v644_v24 }
 0x2e0   :  { %v1587_v40 = vunpack.i.h.bf16 %v1585_v31  ;;  %v1586_v44 = vunpack.i.l.bf16 %v1585_v31  ;;  %v1580_v45 = vpop.permute.xlu1 %1579  ;;  %1504 = vmatprep.subr.bf16.mxu1 %v645_v13 }
 0x2e1   :  { %v1582_v32 = vunpack.i.h.bf16 %v1580_v45  ;;  %v1581_v46 = vunpack.i.l.bf16 %v1580_v45 }
 0x2e2   :  { %v636_v36 = vsel %vm440_vm1, %v1966_v48, %v1586_v44  ;;  %v637_v34 = vsel %vm440_vm1, %v1978_v54, %v1587_v40 }
 0x2e3   :  { %1505 = vmatpush3.bf16.msra.mxu1 %v645_v13  ;;  %v634_v39 = vsel %vm440_vm1, %v1972_v51, %v1581_v46  ;;  %v635_v47 = vsel %vm440_vm1, %v1985_v59, %v1582_v32  ;;  %v647_v49 = vpack.c.bf16 %v637_v34, %v636_v36 }
 0x2e4   :  { %v646_v52 = vpack.c.bf16 %v635_v47, %v634_v39 }
 0x2e6   :  { %1506 = vmatprep.subr.bf16.mxu1 %v646_v52 }
 0x2e7   :  { %v1595_v55 = vpop.permute.xlu0 %1594  ;;  %1507 = vmatpush3.bf16.msra.mxu1 %v646_v52 }
 0x2e8   :  { %v1597_v56 = vunpack.i.h.bf16 %v1595_v55  ;;  %v1596_v57 = vunpack.i.l.bf16 %v1595_v55  ;;  %v1590_v15 = vpop.permute.xlu1 %1589  ;;  %1508 = vmatprep.subr.bf16.mxu1 %v647_v49 }
 0x2e9   :  { %v1592_v48 = vunpack.i.h.bf16 %v1590_v15  ;;  %v1591_v60 = vunpack.i.l.bf16 %v1590_v15 }
 0x2ea   :  { %v640_v54 = vsel %vm440_vm1, %v1998_v11, %v1596_v57  ;;  %v641_v51 = vsel %vm440_vm1, %v2013_v27, %v1597_v56  ;;  %v1614_v11 = vld [vmem:[%s2371_s1 + $0x10] sm:$0xff]   ;;  %v1616_v27 = vld [vmem:[%s2371_s1 + $0x20] sm:$0xff]  }
 0x2eb   :  { %1509 = vmatpush3.bf16.msra.mxu1 %v647_v49  ;;  %v638_v59 = vsel %vm440_vm1, %v2005_v14, %v1591_v60  ;;  %v639_v61 = vsel %vm440_vm1, %v2020_v19, %v1592_v48  ;;  %v649_v33 = vpack.c.bf16 %v641_v51, %v640_v54  ;;  %v1615_v14 = vld [vmem:[%s2371_s1 + $0x18] sm:$0xff]   ;;  %v1617_v19 = vld [vmem:[%s2371_s1 + $0x28] sm:$0xff]  }
 0x2ec   :  { %v648_v63 = vpack.c.bf16 %v639_v61, %v638_v59 }
 0x2ee   :  { %1510 = vmatprep.subr.bf16.mxu1 %v648_v63 }
 0x2ef   :  { %1511 = vmatpush3.bf16.msra.mxu1 %v648_v63 }
 0x2f0   :  { %1512 = vmatprep.subr.bf16.mxu1 %v649_v33 }
 0x2f3   :  { %1513 = vmatpush3.bf16.msra.mxu1 %v649_v33 }
 0x2f6   :  { %1515 = vmatmul.mubr.bf16.vlgmr.msra.gmra.mrb[16].mxu1 %v1613_v38 }
 0x2f7   :  { %1518 = vmatprep.mubr.bf16.mxu1 %v1614_v11 }
 0x2fe   :  { %1519 = vmatmul.mubr.bf16.gmra.mrb[20].mxu1 %v1615_v14 }
 0x2ff   :  { %1522 = vmatprep.mubr.bf16.mxu1 %v1616_v27 }
 0x306   :  { %1523 = vmatmul.mubr.bf16.gmra.mrb[24].mxu1 %v1617_v19 }
 0x307   :  { %1526 = vmatprep.mubr.bf16.mxu1 %v1618_v0 }
 0x30e   :  { %1527 = vmatmul.mubr.bf16.gmra.mrb[28].mxu1 %v1619_v1 }
 0x3c9   :  { %v1516_v5 = vpop.f32.mrb[16].mxu1 }
 0x3ca   :  { %v2139_v35 = vadd.f32 %v1516_v5, %v2136_v4  ;;  %v739_v41 = vpop.f32.mrb[17].mxu1 }
 0x3cb   :  { %v740_v6 = vadd.f32 %v2136_v4, %v739_v41  ;;  %v1517_v7 = vpop.f32.mrb[18].mxu1 }
 0x3cc   :  { %v820_v8 = vmin.f32 %v2139_v35, 0.0  ;;  %v2144_v9 = vadd.f32 %v1517_v7, %v2136_v4  ;;  %v742_v10 = vpop.f32.mrb[19].mxu1  ;;  %vm804_vm4 = vcmp.gt.f32.partialorder %v2139_v35, 0.0 }
 0x3cd   :  { %v818_v12 = vmin.f32 %v740_v6, 0.0  ;;  %v743_v17 = vadd.f32 %v2136_v4, %v742_v10  ;;  %vm802_vm2 = vcmp.gt.f32.partialorder %v740_v6, 0.0 }
 0x3ce   :  { %v838_v21 = vmul.f32 1.442695, %v820_v8  ;;  %v821_v22 = vmin.f32 %v2144_v9, 0.0  ;;  %vm805_vm5 = vcmp.gt.f32.partialorder %v2144_v9, 0.0 }
 0x3cf   :  { %v834_v26 = vmul.f32 1.442695, %v818_v12  ;;  %v819_v28 = vmin.f32 %v743_v17, 0.0  ;;  %vm803_vm3 = vcmp.gt.f32.partialorder %v743_v17, 0.0 }
 0x3d0   :  { %1654 = vpow2.f32 %v838_v21  ;;  %v840_v50 = vmul.f32 1.442695, %v821_v22 }
 0x3d1   :  { %1656 = vpow2.f32 %v834_v26  ;;  %v836_v53 = vmul.f32 1.442695, %v819_v28  ;;  %v1520_v58 = vpop.f32.mrb[20].mxu1 }
 0x3d2   :  { %1658 = vpow2.f32 %v840_v50  ;;  %v2149_v62 = vadd.f32 %v1520_v58, %v2136_v4  ;;  %v755_v29 = vpop.f32.mrb[21].mxu1 }
 0x3d3   :  { %1660 = vpow2.f32 %v836_v53  ;;  %v2152_v30 = vadd.f32 %v2136_v4, %v755_v29  ;;  %v1521_v25 = vpop.f32.mrb[22].mxu1 }
 0x3d4   :  { %v824_v37 = vmin.f32 %v2149_v62, 0.0  ;;  %v2156_v42 = vadd.f32 %v1521_v25, %v2136_v4  ;;  %v758_v16 = vpop.f32.mrb[23].mxu1  ;;  %vm808_vm8 = vcmp.gt.f32.partialorder %v2149_v62, 0.0 }
 0x3d5   :  { %v822_v20 = vmin.f32 %v2152_v30, 0.0  ;;  %v2160_v18 = vadd.f32 %v2136_v4, %v758_v16  ;;  %vm806_vm6 = vcmp.gt.f32.partialorder %v2152_v30, 0.0 }
 0x3d6   :  { %v846_v23 = vmul.f32 1.442695, %v824_v37  ;;  %v825_v43 = vmin.f32 %v2156_v42, 0.0  ;;  %vm809_vm9 = vcmp.gt.f32.partialorder %v2156_v42, 0.0 }
 0x3d7   :  { %v842_v13 = vmul.f32 1.442695, %v822_v20  ;;  %v823_v24 = vmin.f32 %v2160_v18, 0.0  ;;  %vm807_vm7 = vcmp.gt.f32.partialorder %v2160_v18, 0.0 }
 0x3d8   :  { %1662 = vpow2.f32 %v846_v23  ;;  %v848_v31 = vmul.f32 1.442695, %v825_v43 }
 0x3d9   :  { %1664 = vpow2.f32 %v842_v13  ;;  %v844_v40 = vmul.f32 1.442695, %v823_v24  ;;  %v1524_v44 = vpop.f32.mrb[24].mxu1 }
 0x3da   :  { %v1655_v45 = vpop.eup %1654  ;;  %1666 = vpow2.f32 %v848_v31  ;;  %v2165_v32 = vadd.f32 %v1524_v44, %v2136_v4  ;;  %v771_v46 = vpop.f32.mrb[25].mxu1 }
 0x3db   :  { %v1657_v36 = vpop.eup %1656  ;;  %1668 = vpow2.f32 %v844_v40  ;;  %v2168_v34 = vadd.f32 %v2136_v4, %v771_v46  ;;  %v1525_v39 = vpop.f32.mrb[26].mxu1  ;;  %v1381_v60 = vadd.f32 -1.0, %v1655_v45 }
 0x3dc   :  { %v1659_v47 = vpop.eup %1658  ;;  %v828_v49 = vmin.f32 %v2165_v32, 0.0  ;;  %v2172_v52 = vadd.f32 %v1525_v39, %v2136_v4  ;;  %v774_v55 = vpop.f32.mrb[27].mxu1  ;;  %v1379_v56 = vadd.f32 -1.0, %v1657_v36  ;;  %vm812_vm12 = vcmp.gt.f32.partialorder %v2165_v32, 0.0 }
 0x3dd   :  { %v1661_v57 = vpop.eup %1660  ;;  %v826_v15 = vmin.f32 %v2168_v34, 0.0  ;;  %v2176_v48 = vadd.f32 %v2136_v4, %v774_v55  ;;  %v1382_v14 = vadd.f32 -1.0, %v1659_v47  ;;  %v2193_v3 = vsel %vm804_vm4, %v2139_v35, %v1381_v60 }
 0x3de   :  { %v854_v54 = vmul.f32 1.442695, %v828_v49  ;;  %v829_v51 = vmin.f32 %v2172_v52, 0.0  ;;  %v2179_v59 = vsel %vm802_vm2, %v740_v6, %v1379_v56  ;;  %v1380_v61 = vadd.f32 -1.0, %v1661_v57 }
 0x3df   :  { %v850_v33 = vmul.f32 1.442695, %v826_v15  ;;  %v827_v63 = vmin.f32 %v2176_v48, 0.0  ;;  %914 = vrot.lane.b32.xlu1 %v2179_v59, %s1802_s0  ;;  %v2206_v35 = vsel %vm805_vm5, %v2144_v9, %v1382_v14  ;;  %vm810_vm10 = vcmp.gt.f32.partialorder %v2168_v34, 0.0 }
 0x3e0   :  { %1670 = vpow2.f32 %v854_v54  ;;  %v856_v38 = vmul.f32 1.442695, %v829_v51  ;;  %v2184_v11 = vsel %vm803_vm3, %v743_v17, %v1380_v61  ;;  %vm811_vm11 = vcmp.gt.f32.partialorder %v2176_v48, 0.0 }
 0x3e1   :  { %1672 = vpow2.f32 %v850_v33  ;;  %v852_v27 = vmul.f32 1.442695, %v827_v63  ;;  %v1528_v19 = vpop.f32.mrb[28].mxu1  ;;  %916 = vrot.lane.b32.xlu0 %v2184_v11, %s1802_s0  ;;  %vm813_vm13 = vcmp.gt.f32.partialorder %v2172_v52, 0.0 }
 0x3e2   :  { %v1663_v0 = vpop.eup %1662  ;;  %1674 = vpow2.f32 %v856_v38  ;;  %v2190_v1 = vadd.f32 %v1528_v19, %v2136_v4  ;;  %v787_v2 = vpop.f32.mrb[29].mxu1 }
 0x3e3   :  { %v1665_v5 = vpop.eup %1664  ;;  %1676 = vpow2.f32 %v852_v27  ;;  %v2196_v41 = vadd.f32 %v2136_v4, %v787_v2  ;;  %v1529_v6 = vpop.f32.mrb[30].mxu1  ;;  %918 = vrot.lane.b32.xlu1 %v2193_v3, %s1802_s0  ;;  %v1385_v28 = vadd.f32 -1.0, %v1663_v0 }
 0x3e4   :  { %v1667_v7 = vpop.eup %1666  ;;  %v832_v8 = vmin.f32 %v2190_v1, 0.0  ;;  %v2203_v10 = vadd.f32 %v1529_v6, %v2136_v4  ;;  %v790_v12 = vpop.f32.mrb[31].mxu1  ;;  %v1383_v17 = vadd.f32 -1.0, %v1665_v5  ;;  %vm816_vm0 = vcmp.gt.f32.partialorder %v2190_v1, 0.0 }
 0x3e5   :  { %v1669_v21 = vpop.eup %1668  ;;  %v830_v22 = vmin.f32 %v2196_v41, 0.0  ;;  %v791_v26 = vadd.f32 %v2136_v4, %v790_v12  ;;  %920 = vrot.lane.b32.xlu0 %v2206_v35, %s1802_s0  ;;  %v1386_v16 = vadd.f32 -1.0, %v1667_v7  ;;  %v2227_v23 = vsel %vm808_vm8, %v2149_v62, %v1385_v28 }
 0x3e6   :  { %v862_v50 = vmul.f32 1.442695, %v832_v8  ;;  %v833_v53 = vmin.f32 %v2203_v10, 0.0  ;;  %v2215_v58 = vsel %vm806_vm6, %v2152_v30, %v1383_v17  ;;  %v1384_v9 = vadd.f32 -1.0, %v1669_v21 }
 0x3e7   :  { %v858_v29 = vmul.f32 1.442695, %v830_v22  ;;  %v831_v25 = vmin.f32 %v791_v26, 0.0  ;;  %922 = vrot.lane.b32.xlu1 %v2215_v58, %s1802_s0  ;;  %v889_v13 = vsel %vm809_vm9, %v2156_v42, %v1386_v16  ;;  %vm814_vm14 = vcmp.gt.f32.partialorder %v2196_v41, 0.0 }
 0x3e8   :  { %1678 = vpow2.f32 %v862_v50  ;;  %v864_v4 = vmul.f32 1.442695, %v833_v53  ;;  %v2221_v37 = vsel %vm807_vm7, %v2160_v18, %v1384_v9  ;;  %vm815_vm15 = vcmp.gt.f32.partialorder %v791_v26, 0.0 }
 0x3e9   :  { %1680 = vpow2.f32 %v858_v29  ;;  %v860_v20 = vmul.f32 1.442695, %v831_v25  ;;  %924 = vrot.lane.b32.xlu0 %v2221_v37, %s1802_s0  ;;  %vm817_vm2 = vcmp.gt.f32.partialorder %v2203_v10, 0.0 }
 0x3ea   :  { %v1671_v30 = vpop.eup %1670  ;;  %1682 = vpow2.f32 %v864_v4 }
 0x3eb   :  { %v1673_v43 = vpop.eup %1672  ;;  %1684 = vpow2.f32 %v860_v20  ;;  %926 = vrot.lane.b32.xlu1 %v2227_v23, %s1802_s0  ;;  %v1389_v44 = vadd.f32 -1.0, %v1671_v30 }
 0x3ec   :  { %v1675_v18 = vpop.eup %1674  ;;  %v1387_v24 = vadd.f32 -1.0, %v1673_v43  ;;  %v1395_v43 = vld [vmem:[%s2377_s7] ss:$0 sm:$0xff]  ;;  %s1311_s7 = sshll.u32 %s1803_s6, 4  ;;  %s1312_s7 = int_to_ptr.vmem [resolvable:$true] %s1311_s7 }
 0x3ed   :  { %v1677_v31 = vpop.eup %1676  ;;  %928 = vrot.lane.b32.xlu0 %v889_v13, %s1802_s0  ;;  %v1390_v46 = vadd.f32 -1.0, %v1675_v18  ;;  %v892_v36 = vsel %vm812_vm12, %v2165_v32, %v1389_v44  ;;  %s1772_s18 = scalar_lea.vmem %s1312_s7, 2048  ;;  %p1777_p9 = scmp.lt.s32.totalorder %s1312_s7, %s1312_s7 }
 0x3ee   :  { %v890_v40 = vsel %vm810_vm10, %v2168_v34, %v1387_v24  ;;  %v1388_v62 = vadd.f32 -1.0, %v1677_v31  ;;  %p1773_p8 = scmp.ne.s32.totalorder %s1312_s7, %s1772_s18  ;;  %p1778_p10 = scmp.lt.s32.totalorder %s1772_s18, %s1772_s18 }
 0x3ef   :  { %930 = vrot.lane.b32.xlu1 %v890_v40, %s1802_s0  ;;  %v893_v47 = vsel %vm813_vm13, %v2172_v52, %v1390_v46 }
 0x3f0   :  { %v891_v45 = vsel %vm811_vm11, %v2176_v48, %v1388_v62  ;;  %p1779_p11 = por %p1778_p10, %p1777_p9 }
 0x3f1   :  { %932 = vrot.lane.b32.xlu0 %v891_v45, %s1802_s0 }
 0x3f2   :  { %v1679_v42 = vpop.eup %1678  ;;  %p1780_p12 = pnand %p1779_p11, %p1773_p8 }
 0x3f3   :  { %v1681_v39 = vpop.eup %1680  ;;  %934 = vrot.lane.b32.xlu1 %v892_v36, %s1802_s0  ;;  %v1393_v15 = vadd.f32 -1.0, %v1679_v42 }
 0x3f4   :  { %v1683_v34 = vpop.eup %1682  ;;  %v1391_v49 = vadd.f32 -1.0, %v1681_v39 }
 0x3f5   :  { %v1685_v55 = vpop.eup %1684  ;;  %936 = vrot.lane.b32.xlu0 %v893_v47, %s1802_s0  ;;  %v1394_v48 = vadd.f32 -1.0, %v1683_v34  ;;  %v896_v52 = vsel %vm816_vm0, %v2190_v1, %v1393_v15 }
 0x3f6   :  { %v894_v56 = vsel %vm814_vm14, %v2196_v41, %v1391_v49  ;;  %v1392_v57 = vadd.f32 -1.0, %v1685_v55 }
 0x3f7   :  { %938 = vrot.lane.b32.xlu1 %v894_v56, %s1802_s0  ;;  %v897_v60 = vsel %vm817_vm2, %v2203_v10, %v1394_v48 }
 0x3f8   :  { %v895_v32 = vsel %vm815_vm15, %v791_v26, %v1392_v57 }
 0x3f9   :  { %940 = vrot.lane.b32.xlu0 %v895_v32, %s1802_s0 }
 0x3fb   :  { %942 = vrot.lane.b32.xlu1 %v896_v52, %s1802_s0 }
 0x3fd   :  { %944 = vrot.lane.b32.xlu0 %v897_v60, %s1802_s0 }
 0x451   :  { %v915_v54 = vpop.permute.xlu1 %914 }
 0x452   :  { %v962_v61 = vadd.f32 %v915_v54, %v2179_v59 }
 0x453   :  { %v917_v51 = vpop.permute.xlu0 %916 }
 0x454   :  { %v963_v33 = vadd.f32 %v917_v51, %v2184_v11 }
 0x455   :  { %v919_v63 = vpop.permute.xlu1 %918 }
 0x456   :  { %v978_v38 = vpack.c.bf16 %v963_v33, %v962_v61  ;;  %v964_v27 = vadd.f32 %v919_v63, %v2193_v3 }
 0x457   :  { %v921_v14 = vpop.permute.xlu0 %920 }
 0x458   :  { %v965_v19 = vadd.f32 %v921_v14, %v2206_v35  ;;  %1534 = vmatprep.mubr.msk.bf16.mxu0 %vm440_vm1, %v978_v38 }
 0x459   :  { %v923_v0 = vpop.permute.xlu1 %922 }
 0x45a   :  { %v979_v1 = vpack.c.bf16 %v965_v19, %v964_v27  ;;  %v966_v5 = vadd.f32 %v923_v0, %v2215_v58 }
 0x45b   :  { %v925_v2 = vpop.permute.xlu0 %924 }
 0x45c   :  { %v967_v41 = vadd.f32 %v925_v2, %v2221_v37  ;;  %1535 = vmatmul.mubr.msk.bf16.vlgmr.msra.gmra.mrb[16].mxu0 %vm440_vm1, %v979_v1 }
 0x45d   :  { %v927_v59 = vpop.permute.xlu1 %926 }
 0x45e   :  { %v980_v11 = vpack.c.bf16 %v967_v41, %v966_v5  ;;  %v968_v7 = vadd.f32 %v927_v59, %v2227_v23 }
 0x45f   :  { %v929_v6 = vpop.permute.xlu0 %928 }
 0x460   :  { %v969_v8 = vadd.f32 %v929_v6, %v889_v13  ;;  %1538 = vmatprep.mubr.msk.bf16.mxu0 %vm440_vm1, %v980_v11 }
 0x461   :  { %v931_v3 = vpop.permute.xlu1 %930 }
 0x462   :  { %v981_v10 = vpack.c.bf16 %v969_v8, %v968_v7  ;;  %v970_v35 = vadd.f32 %v931_v3, %v890_v40 }
 0x463   :  { %v933_v12 = vpop.permute.xlu0 %932 }
 0x464   :  { %v971_v17 = vadd.f32 %v933_v12, %v891_v45  ;;  %1539 = vmatmul.mubr.msk.bf16.gmra.mrb[20].mxu0 %vm440_vm1, %v981_v10 }
 0x465   :  { %v935_v21 = vpop.permute.xlu1 %934 }
 0x466   :  { %v982_v22 = vpack.c.bf16 %v971_v17, %v970_v35  ;;  %v972_v28 = vadd.f32 %v935_v21, %v892_v36 }
 0x467   :  { %v937_v26 = vpop.permute.xlu0 %936 }
 0x468   :  { %v973_v50 = vadd.f32 %v937_v26, %v893_v47  ;;  %1542 = vmatprep.mubr.msk.bf16.mxu0 %vm440_vm1, %v982_v22 }
 0x469   :  { %v939_v53 = vpop.permute.xlu1 %938 }
 0x46a   :  { %v983_v58 = vpack.c.bf16 %v973_v50, %v972_v28  ;;  %v974_v29 = vadd.f32 %v939_v53, %v894_v56 }
 0x46b   :  { %v941_v9 = vpop.permute.xlu0 %940 }
 0x46c   :  { %v975_v25 = vadd.f32 %v941_v9, %v895_v32  ;;  %1543 = vmatmul.mubr.msk.bf16.gmra.mrb[24].mxu0 %vm440_vm1, %v983_v58 }
 0x46d   :  { %v943_v4 = vpop.permute.xlu1 %942 }
 0x46e   :  { %v984_v37 = vpack.c.bf16 %v975_v25, %v974_v29  ;;  %v976_v20 = vadd.f32 %v943_v4, %v896_v52 }
 0x46f   :  { %v945_v16 = vpop.permute.xlu0 %944 }
 0x470   :  { %v977_v30 = vadd.f32 %v945_v16, %v897_v60  ;;  %1546 = vmatprep.mubr.msk.bf16.mxu0 %vm440_vm1, %v984_v37 }
 0x472   :  { %v985_v23 = vpack.c.bf16 %v977_v30, %v976_v20 }
 0x474   :  { %1547 = vmatmul.mubr.msk.bf16.gmra.mrb[28].mxu0 %vm440_vm1, %v985_v23 }
 0x52f   :  { %v1536_v18 = vpop.f32.mrb[16].mxu0 }
 0x530   :  { %v1076_v13 = vadd.f32 %v1536_v18, %v1395_v43  ;;  %v1067_v24 = vpop.f32.mrb[17].mxu0 }
 0x531   :  { %v1068_v31 = vadd.f32 %v1395_v43, %v1067_v24  ;;  %v1537_v40 = vpop.f32.mrb[18].mxu0 }
 0x532   :  { %1134 = vmax.xlane.f32.xlu0 %v1076_v13  ;;  %v1070_v62 = vpop.f32.mrb[19].mxu0  ;;  %v1079_v45 = vadd.f32 %v1537_v40, %v1395_v43 }
 0x533   :  { %v1071_v44 = vadd.f32 %v1395_v43, %v1070_v62  ;;  %1130 = vmax.xlane.f32.xlu1 %v1068_v31 }
 0x536   :  { %1132 = vmax.xlane.f32.xlu0 %v1071_v44 }
 0x537   :  { %1136 = vmax.xlane.f32.xlu1 %v1079_v45  ;;  %v1540_v46 = vpop.f32.mrb[20].mxu0 }
 0x538   :  { %v1092_v42 = vadd.f32 %v1540_v46, %v1395_v43  ;;  %v1083_v36 = vpop.f32.mrb[21].mxu0 }
 0x539   :  { %v1541_v39 = vpop.f32.mrb[22].mxu0  ;;  %v1084_v49 = vadd.f32 %v1395_v43, %v1083_v36 }
 0x53a   :  { %v1095_v34 = vadd.f32 %v1541_v39, %v1395_v43  ;;  %1142 = vmax.xlane.f32.xlu0 %v1092_v42  ;;  %v1086_v47 = vpop.f32.mrb[23].mxu0 }
 0x53b   :  { %v1087_v55 = vadd.f32 %v1395_v43, %v1086_v47 }
 0x53c   :  { %1144 = vmax.xlane.f32.xlu1 %v1095_v34 }
 0x53e   :  { %1138 = vmax.xlane.f32.xlu0 %v1084_v49 }
 0x53f   :  { %v1544_v56 = vpop.f32.mrb[24].mxu0 }
 0x540   :  { %v1108_v57 = vadd.f32 %v1544_v56, %v1395_v43  ;;  %1140 = vmax.xlane.f32.xlu1 %v1087_v55  ;;  %v1099_v15 = vpop.f32.mrb[25].mxu0 }
 0x541   :  { %v1545_v32 = vpop.f32.mrb[26].mxu0  ;;  %v1100_v60 = vadd.f32 %v1395_v43, %v1099_v15 }
 0x542   :  { %v1111_v48 = vadd.f32 %v1545_v32, %v1395_v43  ;;  %1150 = vmax.xlane.f32.xlu0 %v1108_v57  ;;  %v1102_v52 = vpop.f32.mrb[27].mxu0 }
 0x543   :  { %v2274_v54 = vadd.f32 %v1395_v43, %v1102_v52 }
 0x544   :  { %1152 = vmax.xlane.f32.xlu1 %v1111_v48 }
 0x546   :  { %1146 = vmax.xlane.f32.xlu0 %v1100_v60 }
 0x547   :  { %v1548_v51 = vpop.f32.mrb[28].mxu0 }
 0x548   :  { %1148 = vmax.xlane.f32.xlu1 %v2274_v54  ;;  %v1115_v61 = vpop.f32.mrb[29].mxu0  ;;  %v2282_v27 = vadd.f32 %v1548_v51, %v1395_v43 }
 0x549   :  { %v2277_v33 = vadd.f32 %v1395_v43, %v1115_v61  ;;  %v1549_v63 = vpop.f32.mrb[30].mxu0 }
 0x54a   :  { %v1118_v38 = vpop.f32.mrb[31].mxu0  ;;  %v2285_v19 = vadd.f32 %v1549_v63, %v1395_v43 }
 0x54b   :  { %v2279_v14 = vadd.f32 %v1395_v43, %v1118_v38  ;;  %1154 = vmax.xlane.f32.xlu0 %v2277_v33 }
 0x54d   :  { %1156 = vmax.xlane.f32.xlu1 %v2279_v14 }
 0x54f   :  { %1158 = vmax.xlane.f32.xlu0 %v2282_v27 }
 0x551   :  { %1160 = vmax.xlane.f32.xlu1 %v2285_v19 }
 0x5bf   :  { %v1135_v0 = vpop.xlane.xlu0 %1134 }
 0x5c0   :  { %v2289_v1 = vsub.f32 %v1076_v13, %v1135_v0  ;;  %v1131_v2 = vpop.xlane.xlu1 %1130 }
 0x5c1   :  { %v2291_v5 = vsub.f32 %v1068_v31, %v1131_v2 }
 0x5c2   :  { %v1182_v41 = vmul.f32 1.442695, %v2289_v1 }
 0x5c3   :  { %v1133_v59 = vpop.xlane.xlu0 %1132  ;;  %v1178_v11 = vmul.f32 1.442695, %v2291_v5 }
 0x5c4   :  { %1686 = vpow2.f32 %v1182_v41  ;;  %v1137_v6 = vpop.xlane.xlu1 %1136  ;;  %v2295_v7 = vsub.f32 %v1071_v44, %v1133_v59 }
 0x5c5   :  { %v2297_v8 = vsub.f32 %v1079_v45, %v1137_v6  ;;  %1688 = vpow2.f32 %v1178_v11 }
 0x5c6   :  { %v1180_v35 = vmul.f32 1.442695, %v2295_v7 }
 0x5c7   :  { %v1184_v3 = vmul.f32 1.442695, %v2297_v8  ;;  %v1143_v10 = vpop.xlane.xlu0 %1142 }
 0x5c8   :  { %v2300_v12 = vsub.f32 %v1092_v42, %v1143_v10 }
 0x5c9   :  { %1690 = vpow2.f32 %v1184_v3  ;;  %v1145_v17 = vpop.xlane.xlu1 %1144 }
 0x5ca   :  { %v1190_v21 = vmul.f32 1.442695, %v2300_v12  ;;  %v2304_v22 = vsub.f32 %v1095_v34, %v1145_v17 }
 0x5cb   :  { %v1139_v26 = vpop.xlane.xlu0 %1138 }
 0x5cc   :  { %1692 = vpow2.f32 %v1190_v21  ;;  %v2306_v28 = vsub.f32 %v1084_v49, %v1139_v26  ;;  %v1192_v50 = vmul.f32 1.442695, %v2304_v22 }
 0x5cd   :  { %1694 = vpow2.f32 %v1180_v35  ;;  %v1141_v53 = vpop.xlane.xlu1 %1140 }
 0x5ce   :  { %v1687_v58 = vpop.eup %1686  ;;  %v1186_v9 = vmul.f32 1.442695, %v2306_v28  ;;  %v2310_v29 = vsub.f32 %v1087_v55, %v1141_v53 }
 0x5cf   :  { %v1151_v25 = vpop.xlane.xlu0 %1150  ;;  %1214 = vadd.xlane.f32.xlu0 %v1687_v58  ;;  %v1689_v20 = vpop.eup %1688 }
 0x5d0   :  { %1696 = vpow2.f32 %v1186_v9  ;;  %v2312_v4 = vsub.f32 %v1108_v57, %v1151_v25  ;;  %v1188_v37 = vmul.f32 1.442695, %v2310_v29 }
 0x5d1   :  { %1698 = vpow2.f32 %v1192_v50  ;;  %v1153_v16 = vpop.xlane.xlu1 %1152 }
 0x5d2   :  { %v1198_v30 = vmul.f32 1.442695, %v2312_v4  ;;  %v2316_v23 = vsub.f32 %v1111_v48, %v1153_v16 }
 0x5d3   :  { %v1691_v43 = vpop.eup %1690  ;;  %v1147_v18 = vpop.xlane.xlu0 %1146  ;;  %1210 = vadd.xlane.f32.xlu0 %v1689_v20 }
 0x5d4   :  { %1700 = vpow2.f32 %v1198_v30  ;;  %v2318_v13 = vsub.f32 %v1100_v60, %v1147_v18  ;;  %1216 = vadd.xlane.f32.xlu1 %v1691_v43  ;;  %v1200_v24 = vmul.f32 1.442695, %v2316_v23 }
 0x5d5   :  { %1702 = vpow2.f32 %v1188_v37  ;;  %v1149_v31 = vpop.xlane.xlu1 %1148 }
 0x5d6   :  { %v1693_v40 = vpop.eup %1692  ;;  %v1194_v62 = vmul.f32 1.442695, %v2318_v13  ;;  %v2323_v44 = vsub.f32 %v2274_v54, %v1149_v31 }
 0x5d7   :  { %v1695_v45 = vpop.eup %1694  ;;  %1222 = vadd.xlane.f32.xlu0 %v1693_v40 }
 0x5d8   :  { %1704 = vpow2.f32 %v1194_v62  ;;  %v1196_v46 = vmul.f32 1.442695, %v2323_v44  ;;  %v1155_v42 = vpop.xlane.xlu0 %1154  ;;  %1212 = vadd.xlane.f32.xlu1 %v1695_v45 }
 0x5d9   :  { %1706 = vpow2.f32 %v1200_v24  ;;  %v2327_v36 = vsub.f32 %v2277_v33, %v1155_v42 }
 0x5da   :  { %v1697_v39 = vpop.eup %1696  ;;  %v1157_v34 = vpop.xlane.xlu1 %1156  ;;  %1708 = vpow2.f32 %v1196_v46 }
 0x5db   :  { %v1699_v47 = vpop.eup %1698  ;;  %v1202_v49 = vmul.f32 1.442695, %v2327_v36  ;;  %v2331_v55 = vsub.f32 %v2279_v14, %v1157_v34  ;;  %1218 = vadd.xlane.f32.xlu0 %v1697_v39 }
 0x5dc   :  { %v1159_v56 = vpop.xlane.xlu0 %1158  ;;  %1224 = vadd.xlane.f32.xlu1 %v1699_v47 }
 0x5dd   :  { %1710 = vpow2.f32 %v1202_v49  ;;  %v1204_v57 = vmul.f32 1.442695, %v2331_v55  ;;  %v2335_v15 = vsub.f32 %v2282_v27, %v1159_v56 }
 0x5de   :  { %v1701_v32 = vpop.eup %1700  ;;  %v1161_v48 = vpop.xlane.xlu1 %1160 }
 0x5df   :  { %v1703_v52 = vpop.eup %1702  ;;  %v1206_v60 = vmul.f32 1.442695, %v2335_v15  ;;  %v2339_v54 = vsub.f32 %v2285_v19, %v1161_v48  ;;  %1230 = vadd.xlane.f32.xlu0 %v1701_v32  ;;  %1712 = vpow2.f32 %v1204_v57 }
 0x5e0   :  { %1220 = vadd.xlane.f32.xlu1 %v1703_v52 }
 0x5e1   :  { %1714 = vpow2.f32 %v1206_v60  ;;  %v1208_v51 = vmul.f32 1.442695, %v2339_v54 }
 0x5e2   :  { %v1705_v61 = vpop.eup %1704 }
 0x5e3   :  { %v1707_v33 = vpop.eup %1706  ;;  %1226 = vadd.xlane.f32.xlu0 %v1705_v61  ;;  %1716 = vpow2.f32 %v1208_v51 }
 0x5e4   :  { %1232 = vadd.xlane.f32.xlu1 %v1707_v33  ;;  %v1709_v63 = vpop.eup %1708 }
 0x5e7   :  { %v1711_v38 = vpop.eup %1710 }
 0x5e8   :  { %1234 = vadd.xlane.f32.xlu0 %v1711_v38  ;;  %1228 = vadd.xlane.f32.xlu1 %v1709_v63 }
 0x5e9   :  { %v1713_v14 = vpop.eup %1712 }
 0x5eb   :  { %v1715_v27 = vpop.eup %1714 }
 0x5ec   :  { %1238 = vadd.xlane.f32.xlu0 %v1715_v27  ;;  %1236 = vadd.xlane.f32.xlu1 %v1713_v14 }
 0x5ed   :  { %v1717_v19 = vpop.eup %1716 }
 0x5f0   :  { %1240 = vadd.xlane.f32.xlu1 %v1717_v19 }
 0x65c   :  { %v1215_v0 = vpop.xlane.xlu0 %1214 }
 0x65d   :  { %1718 = vlog2.f32 %v1215_v0 }
 0x660   :  { %v1211_v2 = vpop.xlane.xlu0 %1210 }
 0x661   :  { %1720 = vlog2.f32 %v1211_v2  ;;  %v1217_v41 = vpop.xlane.xlu1 %1216 }
 0x662   :  { %1722 = vlog2.f32 %v1217_v41 }
 0x664   :  { %v1223_v59 = vpop.xlane.xlu0 %1222 }
 0x665   :  { %1724 = vlog2.f32 %v1223_v59  ;;  %v1213_v11 = vpop.xlane.xlu1 %1212 }
 0x666   :  { %1726 = vlog2.f32 %v1213_v11 }
 0x667   :  { %v1719_v6 = vpop.eup %1718 }
 0x668   :  { %v1247_v3 = vmul.f32 0.6931472, %v1719_v6  ;;  %v1219_v10 = vpop.xlane.xlu0 %1218 }
 0x669   :  { %1728 = vlog2.f32 %v1219_v10  ;;  %v1225_v35 = vpop.xlane.xlu1 %1224 }
 0x66a   :  { %v1276_v17 = vsub.f32 %v2289_v1, %v1247_v3  ;;  %1730 = vlog2.f32 %v1225_v35 }
 0x66b   :  { %v1721_v21 = vpop.eup %1720 }
 0x66c   :  { %v1723_v26 = vpop.eup %1722  ;;  %1292 = vst [vmem:[#allocation5 + $0x10] sm:$0xff] %v1276_v17  ;;  %v1243_v50 = vmul.f32 0.6931472, %v1721_v21  ;;  %v1231_v53 = vpop.xlane.xlu0 %1230 }
 0x66d   :  { %v1249_v58 = vmul.f32 0.6931472, %v1723_v26  ;;  %1732 = vlog2.f32 %v1231_v53  ;;  %v1221_v9 = vpop.xlane.xlu1 %1220 }
 0x66e   :  { %v1274_v25 = vsub.f32 %v2291_v5, %v1243_v50  ;;  %1734 = vlog2.f32 %v1221_v9 }
 0x66f   :  { %v1725_v37 = vpop.eup %1724  ;;  %v1277_v16 = vsub.f32 %v2297_v8, %v1249_v58 }
 0x670   :  { %v1727_v20 = vpop.eup %1726  ;;  %1290 = vst [vmem:[#allocation5] sm:$0xff] %v1274_v25  ;;  %v1255_v30 = vmul.f32 0.6931472, %v1725_v37  ;;  %v1227_v43 = vpop.xlane.xlu0 %1226 }
 0x671   :  { %1293 = vst [vmem:[#allocation5 + $0x18] sm:$0xff] %v1277_v16  ;;  %v1245_v1 = vmul.f32 0.6931472, %v1727_v20  ;;  %1736 = vlog2.f32 %v1227_v43  ;;  %v1233_v18 = vpop.xlane.xlu1 %1232 }
 0x672   :  { %v1280_v24 = vsub.f32 %v2300_v12, %v1255_v30  ;;  %1738 = vlog2.f32 %v1233_v18 }
 0x673   :  { %v1729_v31 = vpop.eup %1728  ;;  %v1275_v40 = vsub.f32 %v2295_v7, %v1245_v1 }
 0x674   :  { %v1731_v62 = vpop.eup %1730  ;;  %1296 = vst [vmem:[#allocation5 + $0x30] sm:$0xff] %v1280_v24  ;;  %v1251_v5 = vmul.f32 0.6931472, %v1729_v31 }
 0x675   :  { %1291 = vst [vmem:[#allocation5 + $0x8] sm:$0xff] %v1275_v40  ;;  %v1257_v45 = vmul.f32 0.6931472, %v1731_v62  ;;  %v1235_v8 = vpop.xlane.xlu0 %1234  ;;  %v1229_v46 = vpop.xlane.xlu1 %1228 }
 0x676   :  { %v1278_v42 = vsub.f32 %v2306_v28, %v1251_v5  ;;  %1740 = vlog2.f32 %v1235_v8 }
 0x677   :  { %v1733_v39 = vpop.eup %1732  ;;  %v1281_v34 = vsub.f32 %v2304_v22, %v1257_v45  ;;  %1742 = vlog2.f32 %v1229_v46 }
 0x678   :  { %v1735_v47 = vpop.eup %1734  ;;  %1294 = vst [vmem:[#allocation5 + $0x20] sm:$0xff] %v1278_v42  ;;  %v1263_v12 = vmul.f32 0.6931472, %v1733_v39 }
 0x679   :  { %1297 = vst [vmem:[#allocation5 + $0x38] sm:$0xff] %v1281_v34  ;;  %v1253_v49 = vmul.f32 0.6931472, %v1735_v47  ;;  %v1239_v7 = vpop.xlane.xlu0 %1238  ;;  %v1237_v56 = vpop.xlane.xlu1 %1236 }
 0x67a   :  { %v1284_v57 = vsub.f32 %v2312_v4, %v1263_v12  ;;  %1744 = vlog2.f32 %v1239_v7 }
 0x67b   :  { %v1737_v32 = vpop.eup %1736  ;;  %v1279_v48 = vsub.f32 %v2310_v29, %v1253_v49  ;;  %1746 = vlog2.f32 %v1237_v56 }
 0x67c   :  { %v1739_v28 = vpop.eup %1738  ;;  %1300 = vst [vmem:[#allocation5 + $0x50] sm:$0xff] %v1284_v57  ;;  %v1259_v52 = vmul.f32 0.6931472, %v1737_v32 }
 0x67d   :  { %1295 = vst [vmem:[#allocation5 + $0x28] sm:$0xff] %v1279_v48  ;;  %v1265_v22 = vmul.f32 0.6931472, %v1739_v28  ;;  %v1241_v60 = vpop.xlane.xlu1 %1240 }
 0x67e   :  { %v1282_v51 = vsub.f32 %v2318_v13, %v1259_v52  ;;  %1748 = vlog2.f32 %v1241_v60 }
 0x67f   :  { %v1285_v61 = vsub.f32 %v2316_v23, %v1265_v22 }
 0x680   :  { %v1741_v33 = vpop.eup %1740  ;;  %1298 = vst [vmem:[#allocation5 + $0x40] sm:$0xff] %v1282_v51 }
 0x681   :  { %v1743_v63 = vpop.eup %1742  ;;  %1301 = vst [vmem:[#allocation5 + $0x58] sm:$0xff] %v1285_v61  ;;  %v1267_v4 = vmul.f32 0.6931472, %v1741_v33 }
 0x682   :  { %v1261_v38 = vmul.f32 0.6931472, %v1743_v63 }
 0x683   :  { %v1286_v29 = vsub.f32 %v2327_v36, %v1267_v4 }
 0x684   :  { %v1745_v14 = vpop.eup %1744  ;;  %v1283_v27 = vsub.f32 %v2323_v44, %v1261_v38 }
 0x685   :  { %v1747_v19 = vpop.eup %1746  ;;  %1302 = vst [vmem:[#allocation5 + $0x60] sm:$0xff] %v1286_v29  ;;  %v1271_v0 = vmul.f32 0.6931472, %v1745_v14 }
 0x686   :  { %1299 = vst [vmem:[#allocation5 + $0x48] sm:$0xff] %v1283_v27  ;;  %v1269_v2 = vmul.f32 0.6931472, %v1747_v19 }
 0x687   :  { %v1288_v13 = vsub.f32 %v2335_v15, %v1271_v0 }
 0x688   :  { %v1749_v41 = vpop.eup %1748  ;;  %v1287_v23 = vsub.f32 %v2331_v55, %v1269_v2 }
 0x689   :  { %1304 = vst [vmem:[#allocation5 + $0x70] sm:$0xff] %v1288_v13  ;;  %v1273_v59 = vmul.f32 0.6931472, %v1749_v41 }
 0x68a   :  { %1303 = vst [vmem:[#allocation5 + $0x68] sm:$0xff] %v1287_v23 }
 0x68b   :  { %v1289_v36 = vsub.f32 %v2339_v54, %v1273_v59 }
 0x68d   :  { %1305 = vst [vmem:[#allocation5 + $0x78] sm:$0xff] %v1289_v36 }
 0x68e   :  { %1783 = shalt.err (!%p1780_p12)
}
 0x68f   :  { %s1784_s0 = scalar_lea.hbm %s2378_s8, 2048 }
 0x690   :  { %p1785_p13 = scmp.ne.s32.totalorder %s2378_s8, %s1784_s0  ;;  %p1788_p0 = scmp.lt.u32.totalorder %s1784_s0, %s2378_s8 }
 0x692   :  { %p1790_p1 = pnand %p1788_p0, %p1785_p13 }
 0x694   :  { %1793 = shalt.err (!%p1790_p1)
}
 0x695   :  { %s1804_s25 = smov 128   ;;  %s1805_s4 = smov 8  }
 0x696   :  { %1317 = dma.vmem_to_hbm [thread:$0]  %s1312_s7, 2048, %s2378_s8, [#allocation4], %s1804_s25, %s1804_s25, %s1805_s4  }
 0x697   :  { %1796 = dma.done.wait [#allocation4], 2048  }
 0x698   :  { %1797 = vsyncadd [#allocation4], 4294965248 }
 0x699   :  { %1321 = vsyncpa [#allocation3], 1 }
 0x69a   :  { %1322 = vsyncpa [#allocation4], 1 }

</bundles_post_ra>
